<compile_context>
chip_gen: v5e
topology: v5e:2x2
jax: 0.10.0
libtpu: 0.0.40
codegen_flags: <defaults>
</compile_context>

<pallas_src>
import functools

import jax
import jax.numpy as jnp
from jax.experimental import pallas as pl
from jax.experimental.pallas import tpu as pltpu


def _smc_kernel(x_ref, o_ref, *, s1, s2):
    # x_ref: (tm, 2*s1 + s2) VMEM tile; o_ref: (tm, s1 + s2) VMEM tile.
    first = x_ref[:, :s1]
    third = x_ref[:, s1 + s2 : 2 * s1 + s2]
    second = x_ref[:, s1 : s1 + s2]
    o_ref[:, :s1] = jnp.maximum(first, third)   # VPU max, hides under DMA
    o_ref[:, s1:] = second


def split_max_concat(x, split_size_1, split_size_2):
    """Pallas equivalent of SplitMaxConcat.forward for 2D / 3D inputs."""
    s1 = int(split_size_1)
    s2 = int(split_size_2)
    if x.ndim not in (2, 3):
        raise ValueError(f"only 2D/3D inputs supported, got ndim={x.ndim}")

    D = x.shape[-1]
    if D - s1 - s2 != s1:
        raise ValueError(
            f"third part size ({D - s1 - s2}) must equal splitSize1 ({s1}) "
            "for the elementwise max (same requirement as torch.cat/max)."
        )

    orig_shape = x.shape
    out_d = s1 + s2
    x2 = x.reshape(-1, D)
    M = x2.shape[0]

    # Row-tile selection: 8-aligned, byte-bounded so double-buffered in+out
    # blocks stay far below every generation's scoped-VMEM default.
    itemsize = x2.dtype.itemsize
    if M % 8 == 0:
        rows_cap = max(8, ((2 * 1024 * 1024) // max(1, D * itemsize)) // 8 * 8)
        tm = min(M, 1024, rows_cap)
    else:
        # Ragged row count: take the full extent (tiny for the demo shapes).
        # TODO(synk): pad ragged row counts to a multiple of 8 for large inputs.
        tm = M
    grid = (pl.cdiv(M, tm),)

    kernel = functools.partial(_smc_kernel, s1=s1, s2=s2)

    out2 = pl.pallas_call(
        kernel,
        out_shape=jax.ShapeDtypeStruct((M, out_d), x2.dtype),
        grid_spec=pltpu.PrefetchScalarGridSpec(
            num_scalar_prefetch=0,
            grid=grid,
            in_specs=[pl.BlockSpec((tm, D), lambda i: (i, 0))],
            out_specs=pl.BlockSpec((tm, out_d), lambda i: (i, 0)),
        ),
        compiler_params=pltpu.CompilerParams(
            dimension_semantics=("parallel",),
            vmem_limit_bytes=32 * 1024 * 1024,  # lift v5e's 16 MiB default
        ),
    )(x2)

    return out2.reshape(orig_shape[:-1] + (out_d,))


def split_max_concat_ref(x, s1, s2):
    """Pure-JAX reference mirroring the PyTorch forward."""
    if x.ndim == 2:
        first = x[:, :s1]
        second = x[:, s1 : s1 + s2]
        third = x[:, s1 + s2 :]
    else:
        first = x[:, :, :s1]
        second = x[:, :, s1 : s1 + s2]
        third = x[:, :, s1 + s2 :]
    return jnp.concatenate([jnp.maximum(first, third), second], axis=-1)


if __name__ == "__main__":
    key = jax.random.PRNGKey(0)
    k1, k2 = jax.random.split(key)

    s1, s2 = 12, 8  # hidden = 2*s1 + s2 = 32

    # 3D case: (batch=2, seq=8, hidden=32).
    x3 = jax.random.normal(k1, (2, 8, 2 * s1 + s2), dtype=jnp.float32)
    y3 = jax.block_until_ready(split_max_concat(x3, s1, s2))
    ref3 = split_max_concat_ref(x3, s1, s2)
    assert y3.shape == ref3.shape, (y3.shape, ref3.shape)
    assert y3.dtype == x3.dtype
    assert bool(jnp.array_equal(y3, ref3)), "3D SplitMaxConcat mismatch"

    # 2D case: (batch=4, features=32).
    x2d = jax.random.normal(k2, (4, 2 * s1 + s2), dtype=jnp.float32)
    y2d = jax.block_until_ready(split_max_concat(x2d, s1, s2))
    ref2d = split_max_concat_ref(x2d, s1, s2)
    assert y2d.shape == ref2d.shape, (y2d.shape, ref2d.shape)
    assert bool(jnp.array_equal(y2d, ref2d)), "2D SplitMaxConcat mismatch"

    print("KERNEL_OK")
</pallas_src>

<mosaic_0001>
module attributes {stable_mosaic.version = 11 : i64} {
  func.func @_smc_kernel(%arg0: i32, %arg1: memref<16x32xf32, #tpu.memory_space<vmem>>, %arg2: memref<16x20xf32, #tpu.memory_space<vmem>>) attributes {dimension_semantics = [#tpu.dimension_semantics<parallel>], iteration_bounds = array<i64: 1>, scalar_prefetch = 0 : i64, scratch_operands = 0 : i64, tpu.core_type = #tpu.core_type<tc>, window_params = [{transform_indices = @transform_0, window_bounds = array<i64: 16, 32>}, {transform_indices = @transform_1, window_bounds = array<i64: 16, 20>}]} {
    %c0 = arith.constant 0 : index
    %c0_0 = arith.constant 0 : index
    %0 = vector.load %arg1[%c0, %c0_0] : memref<16x32xf32, #tpu.memory_space<vmem>>, vector<16x12xf32>
    %c0_1 = arith.constant 0 : index
    %c20 = arith.constant 20 : index
    %1 = vector.load %arg1[%c0_1, %c20] : memref<16x32xf32, #tpu.memory_space<vmem>>, vector<16x12xf32>
    %c0_2 = arith.constant 0 : index
    %c12 = arith.constant 12 : index
    %2 = vector.load %arg1[%c0_2, %c12] : memref<16x32xf32, #tpu.memory_space<vmem>>, vector<16x8xf32>
    %3 = arith.maximumf %0, %1 : vector<16x12xf32>
    %c0_3 = arith.constant 0 : index
    %c0_4 = arith.constant 0 : index
    %4 = vector.load %arg2[%c0_3, %c0_4] : memref<16x20xf32, #tpu.memory_space<vmem>>, vector<16x12xf32>
    tpu.vector_store %arg2[%c0_3, %c0_4], %3 {strides = array<i32>} : memref<16x20xf32, #tpu.memory_space<vmem>>, vector<16x12xf32>,
    %c0_5 = arith.constant 0 : index
    %c12_6 = arith.constant 12 : index
    %5 = vector.load %arg2[%c0_5, %c12_6] : memref<16x20xf32, #tpu.memory_space<vmem>>, vector<16x8xf32>
    tpu.vector_store %arg2[%c0_5, %c12_6], %2 {strides = array<i32>} : memref<16x20xf32, #tpu.memory_space<vmem>>, vector<16x8xf32>,
    return
  }
  func.func @transform_0(%arg0: i32) -> (i32, i32) {
    %c0_i32 = arith.constant 0 : i32
    %c0_i32_0 = arith.constant 0 : i32
    return %arg0, %c0_i32 : i32, i32
  }
  func.func @transform_1(%arg0: i32) -> (i32, i32) {
    %c0_i32 = arith.constant 0 : i32
    %c0_i32_0 = arith.constant 0 : i32
    return %arg0, %c0_i32 : i32, i32
  }
}

</mosaic_0001>

<bundles_post_ra>
// kernel: tpu_custom_call.1
= control target key start
LH: loop header
LB: loop body
LE: loop exit
PB: predicated region body
PF: predicated region fallthrough
CT: control target
= control target key end

     0   :  { %6 = vsyncpa [#allocation3], 0  ;;  %s140_s0 = inlined_call_operand.hbm [shape: f32[16,32], index: 0, kind: input, shape index: {}]   ;;  %s141_s1 = inlined_call_operand.hbm [shape: f32[16,20], index: 1, kind: output, shape index: {}]  }
   0x1   :  { %7 = vsyncpa [#allocation4], 0  ;;  %s12_s8 = sshll.u32 %s140_s0, 4  ;;  %s119_s9 = smov [#allocation2]   ;;  %s13_s8 = int_to_ptr.hbm [resolvable:$true] %s12_s8 }
   0x2   :  { %s14_s10 = sshll.u32 %s119_s9, 4  ;;  %s120_s11 = smov 128   ;;  %s15_s10 = int_to_ptr.vmem [resolvable:$true] %s14_s10 }
   0x3   :  { %s121_s12 = smov 8  }
   0x4   :  { %20 = dma.hbm_to_vmem [thread:$0]  %s13_s8, 256, %s15_s10, [#allocation3], %s120_s11, %s120_s11, %s121_s12  }
   0x5   :  { %115 = dma.done.wait [#allocation3], 256  }
   0x6   :  { %116 = vsyncadd [#allocation3], 4294967040  ;;  %v25_v0 = vld [vmem:[#allocation2] sm:$0xff]  ;;  %s122_s13 = smov 108   ;;  %v26_v1 = vld [vmem:[#allocation2 + $0x8] sm:$0xff]  ;;  %vm37_vm0 = vcmask 97280  }
   0x7   :  { %29 = vrot.lane.b32.xlu0 %v25_v0, %s122_s13  ;;  %vm40_vm1 = vcmask 162912   ;;  %s123_s0 = smov [#allocation5]   ;;  %s49_s17 = sshll.u32 %s141_s1, 4  ;;  %s50_s17 = int_to_ptr.hbm [resolvable:$true] %s49_s17 }
   0x8   :  { %s47_s14 = sshll.u32 %s123_s0, 4  ;;  %s48_s14 = int_to_ptr.vmem [resolvable:$true] %s47_s14 }
   0xf   :  { %31 = vrot.lane.b32.xlu0 %v26_v1, %s122_s13 }
  0x79   :  { %v30_v2 = vpop.permute.xlu0 %29 }
  0x7a   :  { %v35_v3 = vmax.f32 %v25_v0, %v30_v2 }
  0x7c   :  { %38 = vst.msk [vmem:[#allocation5] sm:$0xff] %vm37_vm0, %v35_v3 }
  0x7d   :  { %41 = vst.msk [vmem:[#allocation5] sm:$0xff] %vm40_vm1, %v25_v0 }
  0x81   :  { %v32_v4 = vpop.permute.xlu0 %31 }
  0x82   :  { %v36_v5 = vmax.f32 %v26_v1, %v32_v4 }
  0x84   :  { %39 = vst.msk [vmem:[#allocation5 + $0x8] sm:$0xff] %vm37_vm0, %v36_v5 }
  0x85   :  { %42 = vst.msk [vmem:[#allocation5 + $0x8] sm:$0xff] %vm40_vm1, %v26_v1 }
  0x86   :  { %55 = dma.vmem_to_hbm [thread:$0]  %s48_s14, 256, %s50_s17, [#allocation4], %s120_s11, %s120_s11, %s121_s12  }
  0x87   :  { %117 = dma.done.wait [#allocation4], 256  }
  0x88   :  { %118 = vsyncadd [#allocation4], 4294967040 }
  0x89   :  { %60 = vsyncpa [#allocation3], 1 }
  0x8a   :  { %61 = vsyncpa [#allocation4], 1 }

</bundles_post_ra>
